<compile_context>
chip_gen: v6e
topology: v6e:2x2x1
jax: 0.10.0
libtpu: 0.0.40
codegen_flags: <defaults>
</compile_context>

<pallas_src>
import functools

import jax
import jax.numpy as jnp
from jax.experimental import pallas as pl
from jax.experimental.pallas import tpu as pltpu


def _cdiv(a, b):
    return -(-a // b)


def _round_up(x, m):
    return _cdiv(x, m) * m


def _pad_to(a, shape):
    pads = [(0, t - s) for s, t in zip(a.shape, shape)]
    if any(p[1] for p in pads):
        a = jnp.pad(a, pads)
    return a


def _nmlinear_kernel(x_ref, w_std_ref, b_std_ref, w_in_ref, b_in_ref,
                     w_out_ref, b_out_ref, o_ref, mod_ref, *, gating):
    j = pl.program_id(1)

    # nm hidden features depend only on the batch tile -> compute once per
    # batch tile (N axis is "arbitrary", j == 0 runs first for each i).
    @pl.when(j == 0)
    def _():
        m = jnp.dot(x_ref[...], w_in_ref[...],
                    preferred_element_type=jnp.float32)
        m = jnp.maximum(m + b_in_ref[...], 0.0)
        mod_ref[...] = m.astype(mod_ref.dtype)

    # std linear: x @ W_std + b_std   (bf16 MXU inputs, f32 accumulate)
    out = jnp.dot(x_ref[...], w_std_ref[...],
                  preferred_element_type=jnp.float32)
    out = out + b_std_ref[...]

    # out_nm linear on the cached mod features
    z = jnp.dot(mod_ref[...], w_out_ref[...],
                preferred_element_type=jnp.float32)
    z = z + b_out_ref[...]

    if gating == "hard":
        # sign(tanh(z)) == sign(z) exactly (tanh is monotone, tanh(z)=0 iff z=0),
        # so skip the transcendental; keep the 0 -> +1 mapping.
        s = jnp.sign(z)
        gate = jnp.where(s == 0.0, 1.0, s)
    else:
        gate = jnp.tanh(z)

    o_ref[...] = (out * gate).astype(o_ref.dtype)


def nmlinear_forward(x, w_std, b_std, w_in, b_in, w_out, b_out, *,
                     gating="soft", batch_tile=None, n_tile=None,
                     mxu_dtype=jnp.bfloat16):
    """x: [B, in_f]; w_std: [in_f, out_f]; w_in: [in_f, nm_f]; w_out: [nm_f, out_f].

    Weights are already stored transposed ([fan_in, fan_out]) so the kernel
    computes x @ W.
    """
    assert gating in ("soft", "hard")
    B, in_f = x.shape
    assert w_std.shape[0] == in_f and w_in.shape[0] == in_f
    out_f = w_std.shape[1]
    nm_f = w_in.shape[1]
    assert w_out.shape == (nm_f, out_f)

    out_dtype = x.dtype
    mxu_bytes = jnp.dtype(mxu_dtype).itemsize
    out_bytes = jnp.dtype(out_dtype).itemsize

    # ---- padded sizes: lane-dense (128) output/nm dims, sublane-friendly rows ----
    in_fp = _round_up(in_f, 8)
    nm_fp = _round_up(nm_f, 128)
    out_f128 = _round_up(out_f, 128)

    # ---- tile selection (target ~512 rows / ~512 output cols per tile) ----
    if batch_tile is None:
        nb = max(1, _cdiv(B, 512))
        tb = _round_up(_cdiv(B, nb), 8)
    else:
        tb = _round_up(batch_tile, 8)
        nb = _cdiv(B, tb)
    Bp = tb * nb

    if n_tile is None:
        nn = max(1, _cdiv(out_f128, 512))
        tn = _round_up(_cdiv(out_f128, nn), 128)
    else:
        tn = _round_up(n_tile, 128)
        nn = _cdiv(out_f128, tn)
    out_fp = tn * nn

    # ---- pad + cast operands (zero padding is exact for all three linears) ----
    xp = _pad_to(x, (Bp, in_fp)).astype(mxu_dtype)
    w_std_p = _pad_to(w_std, (in_fp, out_fp)).astype(mxu_dtype)
    w_in_p = _pad_to(w_in, (in_fp, nm_fp)).astype(mxu_dtype)
    w_out_p = _pad_to(w_out, (nm_fp, out_fp)).astype(mxu_dtype)
    b_std_p = _pad_to(b_std.reshape(1, out_f), (1, out_fp)).astype(jnp.float32)
    b_in_p = _pad_to(b_in.reshape(1, nm_f), (1, nm_fp)).astype(jnp.float32)
    b_out_p = _pad_to(b_out.reshape(1, out_f), (1, out_fp)).astype(jnp.float32)

    # ---- VMEM footprint -> scoped limit (double-buffered unless noted) ----
    footprint = (
        2 * tb * in_fp * mxu_bytes        # x tile
        + 2 * in_fp * tn * mxu_bytes      # W_std tile
        + 2 * tn * 4                      # b_std tile
        + 1 * in_fp * nm_fp * mxu_bytes   # W_in  (grid-invariant, single-buffered)
        + 1 * nm_fp * 4                   # b_in  (grid-invariant, single-buffered)
        + 2 * nm_fp * tn * mxu_bytes      # W_out tile
        + 2 * tn * 4                      # b_out tile
        + 2 * tb * tn * out_bytes         # output tile
        + tb * nm_fp * mxu_bytes          # mod scratch
    )
    vmem_limit = int(min(max(2 * footprint + (8 << 20), 32 << 20), 64 << 20))

    kernel = functools.partial(_nmlinear_kernel, gating=gating)
    invariant = pl.Buffered(1)  # single-buffer operands whose block never changes

    yp = pl.pallas_call(
        kernel,
        out_shape=jax.ShapeDtypeStruct((Bp, out_fp), out_dtype),
        grid_spec=pltpu.PrefetchScalarGridSpec(
            num_scalar_prefetch=0,
            grid=(nb, nn),
            in_specs=[
                pl.BlockSpec((tb, in_fp), lambda i, j: (i, 0)),    # x tile
                pl.BlockSpec((in_fp, tn), lambda i, j: (0, j)),    # W_std tile
                pl.BlockSpec((1, tn), lambda i, j: (0, j)),        # b_std tile
                pl.BlockSpec((in_fp, nm_fp), lambda i, j: (0, 0),  # W_in (invariant)
                             pipeline_mode=invariant),
                pl.BlockSpec((1, nm_fp), lambda i, j: (0, 0),      # b_in (invariant)
                             pipeline_mode=invariant),
                pl.BlockSpec((nm_fp, tn), lambda i, j: (0, j)),    # W_out tile
                pl.BlockSpec((1, tn), lambda i, j: (0, j)),        # b_out tile
            ],
            out_specs=pl.BlockSpec((tb, tn), lambda i, j: (i, j)),
            scratch_shapes=[pltpu.VMEM((tb, nm_fp), mxu_dtype)],   # cached mod
        ),
        compiler_params=pltpu.CompilerParams(
            dimension_semantics=("parallel", "arbitrary"),
            vmem_limit_bytes=vmem_limit,
        ),
    )(xp, w_std_p, b_std_p, w_in_p, b_in_p, w_out_p, b_out_p)

    return yp[:B, :out_f]


def _torch_linear_init(key, fan_in, fan_out, dtype=jnp.float32):
    """Deterministic init matching nn.Linear defaults (kaiming-uniform-ish).
    Weights stored pre-transposed: [fan_in, fan_out]."""
    kw, kb = jax.random.split(key)
    bound = 1.0 / jnp.sqrt(jnp.asarray(fan_in, dtype))
    w = jax.random.uniform(kw, (fan_in, fan_out), dtype, -bound, bound)
    b = jax.random.uniform(kb, (fan_out,), dtype, -bound, bound)
    return w, b


def _reference(x, w_std, b_std, w_in, b_in, w_out, b_out, gating="soft"):
    out = x @ w_std + b_std
    mod = jax.nn.relu(x @ w_in + b_in)
    sign_ = jnp.tanh(mod @ w_out + b_out)
    if gating == "hard":
        s = jnp.sign(sign_)
        sign_ = jnp.where(s == 0.0, 1.0, s)
    return out * sign_


if __name__ == "__main__":
    # Small shapes consistent with NMLinear(in_features, out_features, nm_features)
    B, in_f, out_f, nm_f = 8, 32, 32, 16

    key = jax.random.PRNGKey(0)
    kx, k_std, k_in, k_out = jax.random.split(key, 4)

    x = jax.random.normal(kx, (B, in_f), jnp.float32)
    w_std, b_std = _torch_linear_init(k_std, in_f, out_f)
    w_in, b_in = _torch_linear_init(k_in, in_f, nm_f)
    w_out, b_out = _torch_linear_init(k_out, nm_f, out_f)

    # Soft gating (bf16-MXU, f32 elementwise -> loose tolerance vs f32 reference).
    y_soft = jax.block_until_ready(
        nmlinear_forward(x, w_std, b_std, w_in, b_in, w_out, b_out, gating="soft"))
    y_ref_soft = _reference(x, w_std, b_std, w_in, b_in, w_out, b_out, "soft")
    assert y_soft.shape == y_ref_soft.shape
    assert jnp.allclose(y_soft, y_ref_soft, atol=5e-2, rtol=5e-2), "soft gating mismatch"

    # Hard gating: bf16 rounding can flip sign() for pre-activations near zero,
    # so compare magnitudes (|out * +-1| == |out|), which is rounding-robust.
    y_hard = jax.block_until_ready(
        nmlinear_forward(x, w_std, b_std, w_in, b_in, w_out, b_out, gating="hard"))
    y_ref_hard = _reference(x, w_std, b_std, w_in, b_in, w_out, b_out, "hard")
    assert jnp.allclose(jnp.abs(y_hard), jnp.abs(y_ref_hard), atol=5e-2, rtol=5e-2), \
        "hard gating mismatch"

    print("KERNEL_OK")
</pallas_src>

<mosaic_0001>
module attributes {stable_mosaic.version = 11 : i64} {
  func.func @_nmlinear_kernel(%arg0: i32, %arg1: i32, %arg2: memref<8x32xbf16, #tpu.memory_space<vmem>>, %arg3: memref<32x128xbf16, #tpu.memory_space<vmem>>, %arg4: memref<1x128xf32, #tpu.memory_space<vmem>>, %arg5: memref<32x128xbf16, #tpu.memory_space<vmem>>, %arg6: memref<1x128xf32, #tpu.memory_space<vmem>>, %arg7: memref<128x128xbf16, #tpu.memory_space<vmem>>, %arg8: memref<1x128xf32, #tpu.memory_space<vmem>>, %arg9: memref<8x128xf32, #tpu.memory_space<vmem>>, %arg10: memref<8x128xbf16, #tpu.memory_space<vmem>>) attributes {dimension_semantics = [#tpu.dimension_semantics<parallel>, #tpu.dimension_semantics<arbitrary>], iteration_bounds = array<i64: 1, 1>, scalar_prefetch = 0 : i64, scratch_operands = 1 : i64, tpu.core_type = #tpu.core_type<tc>, window_params = [{transform_indices = @transform_0, window_bounds = array<i64: 8, 32>}, {transform_indices = @transform_1, window_bounds = array<i64: 32, 128>}, {transform_indices = @transform_2, window_bounds = array<i64: 1, 128>}, {pipeline_mode = #tpu.pipeline_mode<synchronous>, transform_indices = @transform_3, window_bounds = array<i64: 32, 128>}, {pipeline_mode = #tpu.pipeline_mode<synchronous>, transform_indices = @transform_4, window_bounds = array<i64: 1, 128>}, {transform_indices = @transform_5, window_bounds = array<i64: 128, 128>}, {transform_indices = @transform_6, window_bounds = array<i64: 1, 128>}, {transform_indices = @transform_7, window_bounds = array<i64: 8, 128>}]} {
    %c0_i32 = arith.constant 0 : i32
    %0 = arith.cmpi eq, %arg1, %c0_i32 : i32
    %1 = arith.extui %0 : i1 to i32
    %c0_i32_0 = arith.constant 0 : i32
    %2 = arith.cmpi ne, %1, %c0_i32_0 : i32
    scf.if %2 {
      %c0_15 = arith.constant 0 : index
      %c0_16 = arith.constant 0 : index
      %18 = vector.load %arg2[%c0_15, %c0_16] : memref<8x32xbf16, #tpu.memory_space<vmem>>, vector<8x32xbf16>
      %c0_17 = arith.constant 0 : index
      %c0_18 = arith.constant 0 : index
      %19 = vector.load %arg5[%c0_17, %c0_18] : memref<32x128xbf16, #tpu.memory_space<vmem>>, vector<32x128xbf16>
      %cst_19 = arith.constant dense<0.000000e+00> : vector<8x128xf32>
      %20 = tpu.matmul %18, %19, %cst_19 {dimension_numbers = #tpu.dot_dimension_numbers<[1], [0], [0], [1], [0, 0, 1, 1], [], []>} : vector<8x32xbf16>, vector<32x128xbf16>, vector<8x128xf32> -> vector<8x128xf32>
      %c0_20 = arith.constant 0 : index
      %c0_21 = arith.constant 0 : index
      %21 = vector.load %arg6[%c0_20, %c0_21] : memref<1x128xf32, #tpu.memory_space<vmem>>, vector<1x128xf32>
      %22 = vector.broadcast %21 : vector<1x128xf32> to vector<8x128xf32>
      %23 = arith.addf %20, %22 : vector<8x128xf32>
      %cst_22 = arith.constant 0.000000e+00 : f32
      %24 = vector.broadcast %cst_22 : f32 to vector<8x128xf32>
      %25 = arith.maximumf %23, %24 : vector<8x128xf32>
      %26 = arith.truncf %25 : vector<8x128xf32> to vector<8x128xbf16>
      %c0_23 = arith.constant 0 : index
      %c0_24 = arith.constant 0 : index
      %27 = vector.load %arg10[%c0_23, %c0_24] : memref<8x128xbf16, #tpu.memory_space<vmem>>, vector<8x128xbf16>
      tpu.vector_store %arg10[%c0_23, %c0_24], %26 {strides = array<i32>} : memref<8x128xbf16, #tpu.memory_space<vmem>>, vector<8x128xbf16>,
    } else {
    }
    %c0 = arith.constant 0 : index
    %c0_1 = arith.constant 0 : index
    %3 = vector.load %arg2[%c0, %c0_1] : memref<8x32xbf16, #tpu.memory_space<vmem>>, vector<8x32xbf16>
    %c0_2 = arith.constant 0 : index
    %c0_3 = arith.constant 0 : index
    %4 = vector.load %arg3[%c0_2, %c0_3] : memref<32x128xbf16, #tpu.memory_space<vmem>>, vector<32x128xbf16>
    %cst = arith.constant dense<0.000000e+00> : vector<8x128xf32>
    %5 = tpu.matmul %3, %4, %cst {dimension_numbers = #tpu.dot_dimension_numbers<[1], [0], [0], [1], [0, 0, 1, 1], [], []>} : vector<8x32xbf16>, vector<32x128xbf16>, vector<8x128xf32> -> vector<8x128xf32>
    %c0_4 = arith.constant 0 : index
    %c0_5 = arith.constant 0 : index
    %6 = vector.load %arg4[%c0_4, %c0_5] : memref<1x128xf32, #tpu.memory_space<vmem>>, vector<1x128xf32>
    %7 = vector.broadcast %6 : vector<1x128xf32> to vector<8x128xf32>
    %8 = arith.addf %5, %7 : vector<8x128xf32>
    %c0_6 = arith.constant 0 : index
    %c0_7 = arith.constant 0 : index
    %9 = vector.load %arg10[%c0_6, %c0_7] : memref<8x128xbf16, #tpu.memory_space<vmem>>, vector<8x128xbf16>
    %c0_8 = arith.constant 0 : index
    %c0_9 = arith.constant 0 : index
    %10 = vector.load %arg7[%c0_8, %c0_9] : memref<128x128xbf16, #tpu.memory_space<vmem>>, vector<128x128xbf16>
    %cst_10 = arith.constant dense<0.000000e+00> : vector<8x128xf32>
    %11 = tpu.matmul %9, %10, %cst_10 {dimension_numbers = #tpu.dot_dimension_numbers<[1], [0], [0], [1], [0, 0, 1, 1], [], []>} : vector<8x128xbf16>, vector<128x128xbf16>, vector<8x128xf32> -> vector<8x128xf32>
    %c0_11 = arith.constant 0 : index
    %c0_12 = arith.constant 0 : index
    %12 = vector.load %arg8[%c0_11, %c0_12] : memref<1x128xf32, #tpu.memory_space<vmem>>, vector<1x128xf32>
    %13 = vector.broadcast %12 : vector<1x128xf32> to vector<8x128xf32>
    %14 = arith.addf %11, %13 : vector<8x128xf32>
    %15 = math.tanh %14 : vector<8x128xf32>
    %16 = arith.mulf %8, %15 : vector<8x128xf32>
    %c0_13 = arith.constant 0 : index
    %c0_14 = arith.constant 0 : index
    %17 = vector.load %arg9[%c0_13, %c0_14] : memref<8x128xf32, #tpu.memory_space<vmem>>, vector<8x128xf32>
    tpu.vector_store %arg9[%c0_13, %c0_14], %16 {strides = array<i32>} : memref<8x128xf32, #tpu.memory_space<vmem>>, vector<8x128xf32>,
    return
  }
  func.func @transform_0(%arg0: i32, %arg1: i32) -> (i32, i32) {
    %c0_i32 = arith.constant 0 : i32
    %c0_i32_0 = arith.constant 0 : i32
    return %arg0, %c0_i32 : i32, i32
  }
  func.func @transform_1(%arg0: i32, %arg1: i32) -> (i32, i32) {
    %c0_i32 = arith.constant 0 : i32
    %c0_i32_0 = arith.constant 0 : i32
    return %c0_i32, %arg1 : i32, i32
  }
  func.func @transform_2(%arg0: i32, %arg1: i32) -> (i32, i32) {
    %c0_i32 = arith.constant 0 : i32
    %c0_i32_0 = arith.constant 0 : i32
    return %c0_i32, %arg1 : i32, i32
  }
  func.func @transform_3(%arg0: i32, %arg1: i32) -> (i32, i32) {
    %c0_i32 = arith.constant 0 : i32
    %c0_i32_0 = arith.constant 0 : i32
    %c0_i32_1 = arith.constant 0 : i32
    return %c0_i32, %c0_i32_0 : i32, i32
  }
  func.func @transform_4(%arg0: i32, %arg1: i32) -> (i32, i32) {
    %c0_i32 = arith.constant 0 : i32
    %c0_i32_0 = arith.constant 0 : i32
    %c0_i32_1 = arith.constant 0 : i32
    return %c0_i32, %c0_i32_0 : i32, i32
  }
  func.func @transform_5(%arg0: i32, %arg1: i32) -> (i32, i32) {
    %c0_i32 = arith.constant 0 : i32
    %c0_i32_0 = arith.constant 0 : i32
    return %c0_i32, %arg1 : i32, i32
  }
  func.func @transform_6(%arg0: i32, %arg1: i32) -> (i32, i32) {
    %c0_i32 = arith.constant 0 : i32
    %c0_i32_0 = arith.constant 0 : i32
    return %c0_i32, %arg1 : i32, i32
  }
  func.func @transform_7(%arg0: i32, %arg1: i32) -> (i32, i32) {
    %c0_i32 = arith.constant 0 : i32
    return %arg0, %arg1 : i32, i32
  }
}

</mosaic_0001>

<bundles_post_ra>
// kernel: tpu_custom_call.1
= control target key start
LH: loop header
LB: loop body
LE: loop exit
PB: predicated region body
PF: predicated region fallthrough
CT: control target
= control target key end

     0   :  { %12 = vsyncpa [#allocation4], 0  ;;  %s642_s0 = inlined_call_operand.hbm [shape: bf16[8,32], index: 0, kind: input, shape index: {}]   ;;  %s643_s1 = inlined_call_operand.hbm [shape: bf16[32,128], index: 1, kind: input, shape index: {}]   ;;  %s644_s2 = inlined_call_operand.vmem [shape: f32[1,128], index: 2, kind: input, shape index: {}]   ;;  %s645_s3 = inlined_call_operand.hbm [shape: bf16[32,128], index: 3, kind: input, shape index: {}]   ;;  %s646_s4 = inlined_call_operand.vmem [shape: f32[1,128], index: 4, kind: input, shape index: {}]   ;;  %s647_s5 = inlined_call_operand.hbm [shape: bf16[128,128], index: 5, kind: input, shape index: {}]   ;;  %s648_s6 = inlined_call_operand.vmem [shape: f32[1,128], index: 6, kind: input, shape index: {}]   ;;  %s649_s7 = inlined_call_operand.hbm [shape: f32[8,128], index: 7, kind: output, shape index: {}]  }
   0x1   :  { %13 = vsyncpa [#allocation7], 0 }
   0x2   :  { %14 = vsyncpa [#allocation10], 0 }
   0x3   :  { %15 = vsyncpa [#allocation5], 0  ;;  %s555_s24 = smov [#allocation6]  }
   0x4   :  { %s31_s25 = sshll.u32 %s555_s24, 4  ;;  %s32_s25 = int_to_ptr.vmem [resolvable:$true] %s31_s25 }
   0x5   :  { %s455_s26 = scalar_lea.vmem %s32_s25, 256  ;;  %p460_p1 = scmp.lt.s32.totalorder %s32_s25, %s32_s25 }
   0x6   :  { %p456_p0 = scmp.ne.s32.totalorder %s32_s25, %s455_s26  ;;  %p461_p2 = scmp.lt.s32.totalorder %s455_s26, %s455_s26 }
   0x8   :  { %p462_p3 = por %p461_p2, %p460_p1 }
   0xa   :  { %p463_p4 = pnand %p462_p3, %p456_p0 }
   0xc   :  { %466 = shalt.err (!%p463_p4)
}
   0xd   :  { %s556_s27 = smov 64   ;;  %s557_s28 = smov 4  }
   0xe   :  { %37 = dma.hbm_to_vmem [thread:$0]  %s643_s1, 256, %s32_s25, [#allocation7], %s556_s27, %s556_s27, %s557_s28  }
   0xf   :  { %s558_s8 = smov [#allocation3]   ;;  %s559_s10 = smov [#allocation8]  }
  0x10   :  { %s22_s9 = sshll.u32 %s558_s8, 4  ;;  %s45_s11 = sshll.u32 %s559_s10, 4  ;;  %s23_s9 = int_to_ptr.vmem [resolvable:$true] %s22_s9  ;;  %s46_s11 = int_to_ptr.vmem [resolvable:$true] %s45_s11 }
  0x11   :  { %s475_s12 = scalar_lea.vmem %s23_s9, 64  ;;  %p480_p6 = scmp.lt.s32.totalorder %s23_s9, %s23_s9 }
  0x12   :  { %p476_p5 = scmp.ne.s32.totalorder %s23_s9, %s475_s12  ;;  %p481_p7 = scmp.lt.s32.totalorder %s475_s12, %s475_s12 }
  0x14   :  { %p482_p8 = por %p481_p7, %p480_p6 }
  0x16   :  { %p483_p9 = pnand %p482_p8, %p476_p5 }
  0x18   :  { %486 = shalt.err (!%p483_p9)
}
  0x19   :  { %25 = dma.hbm_to_vmem [thread:$0]  %s642_s0, 64, %s23_s9, [#allocation4]  }
  0x1a   :  { %s495_s15 = scalar_lea.vmem %s46_s11, 256  ;;  %p500_p11 = scmp.lt.s32.totalorder %s46_s11, %s46_s11 }
  0x1b   :  { %p496_p10 = scmp.ne.s32.totalorder %s46_s11, %s495_s15  ;;  %p501_p12 = scmp.lt.s32.totalorder %s495_s15, %s495_s15 }
  0x1d   :  { %p502_p13 = por %p501_p12, %p500_p11 }
  0x1f   :  { %p503_p0 = pnand %p502_p13, %p496_p10 }
  0x21   :  { %506 = shalt.err (!%p503_p0)
}
  0x22   :  { %51 = dma.hbm_to_vmem [thread:$0]  %s645_s3, 256, %s46_s11, [#allocation7], %s556_s27, %s556_s27, %s557_s28  }
  0x23   :  { %s560_s17 = smov [#allocation9]  }
  0x24   :  { %s59_s18 = sshll.u32 %s560_s17, 4  ;;  %s60_s18 = int_to_ptr.vmem [resolvable:$true] %s59_s18 }
  0x25   :  { %s515_s19 = scalar_lea.vmem %s60_s18, 1024  ;;  %p520_p2 = scmp.lt.s32.totalorder %s60_s18, %s60_s18 }
  0x26   :  { %p516_p1 = scmp.ne.s32.totalorder %s60_s18, %s515_s19  ;;  %p521_p3 = scmp.lt.s32.totalorder %s515_s19, %s515_s19 }
  0x28   :  { %p522_p4 = por %p521_p3, %p520_p2 }
  0x2a   :  { %p523_p5 = pnand %p522_p4, %p516_p1 }
  0x2c   :  { %526 = shalt.err (!%p523_p5)
}
  0x2d   :  { %65 = dma.hbm_to_vmem [thread:$0]  %s647_s5, 1024, %s60_s18, [#allocation10], %s556_s27, %s556_s27, %s557_s28  }
  0x2e   :  { %547 = dma.done.wait [#allocation4], 64  }
  0x2f   :  { %548 = vsyncadd [#allocation4], 4294967232 }
  0x30   :  { %549 = dma.done.wait [#allocation7], 512  }
  0x31   :  { %550 = vsyncadd [#allocation7], 4294966784 }
  0x32   :  { %551 = dma.done.wait [#allocation10], 1024  }
  0x33   :  { %552 = vsyncadd [#allocation10], 4294966272  ;;  %v561_v0 = vmov 0.0   ;;  %vm562_vm0 = vmmov 0   ;;  %v433_v1 = vld [vmem:[#allocation8 + $0x8] sm:$0xff]   ;;  %v434_v2 = vld [vmem:[#allocation8] sm:$0xff]  }
  0x34   :  { %388 = vmatprep.subr.bf16.mxu1 %v561_v0  ;;  %392 = vmatprep.mubr.msk.bf16.mxu1 %vm562_vm0, %v561_v0  ;;  %v435_v3 = vld [vmem:[#allocation9 + $0x38] sm:$0xff]   ;;  %v436_v4 = vld [vmem:[#allocation9 + $0x30] sm:$0xff]   ;;  %vm109_vm1 = vcmask 261120   ;;  %v437_v6 = vld [vmem:[#allocation9 + $0x28] sm:$0xff]   ;;  %s563_s24 = smov [#allocation11]  }
  0x35   :  { %404 = vmatprep.subr.bf16.mxu0 %v561_v0  ;;  %420 = vmatprep.mubr.msk.bf16.mxu0 %vm562_vm0, %v561_v0  ;;  %v85_v5 = vld [vmem:[#allocation3] sm:$0xf]  ;;  %v438_v7 = vld [vmem:[#allocation9 + $0x20] sm:$0xff]   ;;  %v440_v9 = vld [vmem:[#allocation9 + $0x10] sm:$0xff]   ;;  %s345_s25 = sshll.u32 %s563_s24, 4  ;;  %s346_s25 = int_to_ptr.vmem [resolvable:$true] %s345_s25 }
  0x36   :  { %389 = vmatpush3.bf16.msra.mxu1 %v433_v1  ;;  %405 = vmatpush3.bf16.msra.mxu0 %v435_v3  ;;  %v439_v8 = vld [vmem:[#allocation9 + $0x18] sm:$0xff]   ;;  %v441_v10 = vld [vmem:[#allocation9 + $0x8] sm:$0xff]   ;;  %v442_v11 = vld [vmem:[#allocation9] sm:$0xff]   ;;  %s527_s26 = scalar_lea.vmem %s346_s25, 128  ;;  %p532_p7 = scmp.lt.s32.totalorder %s346_s25, %s346_s25 }
  0x37   :  { %390 = vmatprep.subr.bf16.mxu1 %v561_v0  ;;  %406 = vmatprep.subr.bf16.mxu0 %v561_v0  ;;  %v443_v12 = vld [vmem:[#allocation6 + $0x8] sm:$0xff]   ;;  %v444_v13 = vld [vmem:[#allocation6] sm:$0xff]   ;;  %v156_v14 = vld [vmem:[#allocation3] sm:$0xf]  ;;  %p528_p6 = scmp.ne.s32.totalorder %s346_s25, %s527_s26  ;;  %p533_p8 = scmp.lt.s32.totalorder %s527_s26, %s527_s26 }
  0x38   :  { %v356_v15 = vld [vmem:[%s646_s4] ss:$0 sm:$0xff] }
  0x39   :  { %v364_v28 = vld [vmem:[%s648_s6] ss:$0 sm:$0xff]  ;;  %p534_p9 = por %p533_p8, %p532_p7 }
  0x3a   :  { %391 = vmatpush3.bf16.msra.mxu1 %v434_v2  ;;  %407 = vmatpush3.bf16.msra.mxu0 %v436_v4  ;;  %v360_v34 = vld [vmem:[%s644_s2] ss:$0 sm:$0xff] }
  0x3b   :  { %396 = vmatprep.subr.bf16.mxu1 %v561_v0  ;;  %408 = vmatprep.subr.bf16.mxu0 %v561_v0  ;;  %p535_p10 = pnand %p534_p9, %p528_p6 }
  0x3d   :  { %393 = vmatmul.mubr.msk.bf16.vlgmr.msra.gmra.mxu1 %vm109_vm1, %v85_v5 }
  0x3e   :  { %400 = vmatprep.mubr.msk.bf16.mxu1 %vm562_vm0, %v561_v0  ;;  %409 = vmatpush3.bf16.msra.mxu0 %v437_v6 }
  0x3f   :  { %410 = vmatprep.subr.bf16.mxu0 %v561_v0  ;;  %397 = vmatpush3.bf16.msra.mxu1 %v443_v12 }
  0x40   :  { %398 = vmatprep.subr.bf16.mxu1 %v561_v0 }
  0x42   :  { %411 = vmatpush3.bf16.msra.mxu0 %v438_v7 }
  0x43   :  { %412 = vmatprep.subr.bf16.mxu0 %v561_v0  ;;  %399 = vmatpush3.bf16.msra.mxu1 %v444_v13 }
  0x46   :  { %413 = vmatpush3.bf16.msra.mxu0 %v439_v8  ;;  %401 = vmatmul.mubr.msk.bf16.vlgmr.msra.gmra.mxu1 %vm109_vm1, %v156_v14 }
  0x47   :  { %414 = vmatprep.subr.bf16.mxu0 %v561_v0 }
  0x4a   :  { %415 = vmatpush3.bf16.msra.mxu0 %v440_v9 }
  0x4b   :  { %416 = vmatprep.subr.bf16.mxu0 %v561_v0 }
  0x4e   :  { %417 = vmatpush3.bf16.msra.mxu0 %v441_v10 }
  0x4f   :  { %418 = vmatprep.subr.bf16.mxu0 %v561_v0 }
  0x52   :  { %419 = vmatpush3.bf16.msra.mxu0 %v442_v11 }
  0xfd   :  { %v147_v16 = vpop.f32.mrf.mxu1 }
  0xfe   :  { %v148_v17 = vadd.f32 %v356_v15, %v147_v16 }
  0xff   :  { %v394_v18 = vpop.f32.mrf.mxu1 }
 0x100   :  { %v153_v19 = vmax.f32 %v148_v17, 0.0 }
 0x101   :  { %v150_v20 = vpop.f32.mrf.mxu1 }
 0x102   :  { %v154_v21 = vpack.c.bf16 %v153_v19, %v153_v19 }
 0x103   :  { %v395_v22 = vpop.f32.mrf.mxu1 }
 0x104   :  { %155 = vst [vmem:[#allocation2] sm:$0xf] %v154_v21 }
 0x106   :  { %v218_v24 = vpop.f32.mrf.mxu1 }
 0x107   :  { %v219_v35 = vadd.f32 %v360_v34, %v218_v24 }
 0x108   :  { %v402_v25 = vpop.f32.mrf.mxu1 }
 0x10a   :  { %v221_v26 = vpop.f32.mrf.mxu1 }
 0x10b   :  { %v224_v23 = vld [vmem:[#allocation2] sm:$0xf] }
 0x10c   :  { %421 = vmatmul.mubr.bf16.vlgmr.msra.gmra.mxu0 %v224_v23  ;;  %v403_v27 = vpop.f32.mrf.mxu1 }
 0x1cc   :  { %v330_v29 = vpop.f32.mrf.mxu0 }
 0x1cd   :  { %v331_v30 = vadd.f32 %v364_v28, %v330_v29 }
 0x1ce   :  { %v422_v31 = vpop.f32.mrf.mxu0 }
 0x1cf   :  { %445 = vtanh.f32 %v331_v30 }
 0x1d0   :  { %v333_v32 = vpop.f32.mrf.mxu0 }
 0x1d2   :  { %v423_v33 = vpop.f32.mrf.mxu0 }
 0x1dc   :  { %v446_v36 = vpop.eup %445 }
 0x1dd   :  { %v337_v37 = vmul.f32 %v446_v36, %v219_v35 }
 0x1df   :  { %338 = vst [vmem:[#allocation11] sm:$0xff] %v337_v37 }
 0x1e0   :  { %538 = shalt.err (!%p535_p10)
}
 0x1e1   :  { %348 = dma.vmem_to_hbm [thread:$0]  %s346_s25, 128, %s649_s7, [#allocation5]  }
 0x1e2   :  { %553 = dma.done.wait [#allocation5], 128  }
 0x1e3   :  { %554 = vsyncadd [#allocation5], 4294967168 }
 0x1e4   :  { %352 = vsyncpa [#allocation4], 1 }
 0x1e5   :  { %353 = vsyncpa [#allocation7], 1 }
 0x1e6   :  { %354 = vsyncpa [#allocation10], 1 }
 0x1e7   :  { %355 = vsyncpa [#allocation5], 1 }

</bundles_post_ra>
